<compile_context>
chip_gen: v7x
topology: tpu7x:2x2x1
jax: 0.10.0
libtpu: 0.0.40
codegen_flags: <defaults>
</compile_context>

<pallas_src>
import math
import jax
import jax.numpy as jnp
import numpy as np
from jax.experimental import pallas as pl
from jax.experimental.pallas import tpu as pltpu


# ----------------------------- kernel ---------------------------------------

def _rms_norm_f32(x, w, eps):
    x = x.astype(jnp.float32)
    var = jnp.mean(x * x, axis=-1, keepdims=True)
    return x * jax.lax.rsqrt(var + eps) * w


def _make_kernel(NL, S, H, NH, HD, NKV, INTER, eps):
    n_rep = NH // NKV
    KV = S + NL
    scale = 1.0 / math.sqrt(HD)
    mmdt = jnp.bfloat16
    f32 = jnp.float32

    def kernel(lat_ref, ctx_ref,
               wln_lat_ref, wln_ctx_ref, wln_post_ref,
               wq_ref, wk_ref, wv_ref, wo_ref,
               wgu_ref, wd_ref,
               out_ref):
        lat = lat_ref[0].astype(f32)                     # (NL, H)
        ctx = ctx_ref[0].astype(f32)                     # (S,  H)

        # input RMSNorms (f32 elementwise)
        lat_n = _rms_norm_f32(lat, wln_lat_ref[...], eps)
        ctx_n = _rms_norm_f32(ctx, wln_ctx_ref[...], eps)

        # hidden_states = concat([context, latents], dim=-2), kept in registers.
        hidden_b = jnp.concatenate([ctx_n, lat_n], axis=0).astype(mmdt)   # (KV, H)
        lat_b = lat_n.astype(mmdt)

        # projections: bf16 operands, f32 accumulation on the MXU
        q = jnp.dot(lat_b, wq_ref[...], preferred_element_type=f32)       # (NL, NH*HD)
        k = jnp.dot(hidden_b, wk_ref[...], preferred_element_type=f32)    # (KV, NKV*HD)
        v = jnp.dot(hidden_b, wv_ref[...], preferred_element_type=f32)    # (KV, NKV*HD)

        # Row-stack all query heads: row h*NL + i  <->  (head h, query i).
        q_stack = jnp.concatenate(
            [q[:, h * HD:(h + 1) * HD] for h in range(NH)], axis=0
        ).astype(mmdt)                                                     # (NH*NL, HD)

        # Grouped-query attention: one (n_rep*NL, HD)x(HD, KV) scores matmul and
        # one (n_rep*NL, KV)x(KV, HD) p@v matmul per kv head group.
        head_out = [None] * NH
        for g in range(NKV):
            qg = q_stack[g * n_rep * NL:(g + 1) * n_rep * NL, :]           # (n_rep*NL, HD)
            kg = k[:, g * HD:(g + 1) * HD].astype(mmdt)                    # (KV, HD)
            vg = v[:, g * HD:(g + 1) * HD].astype(mmdt)                    # (KV, HD)

            s = jnp.einsum('nd,kd->nk', qg, kg,
                           preferred_element_type=f32) * scale             # (n_rep*NL, KV)
            s = s - jnp.max(s, axis=-1, keepdims=True)
            p = jnp.exp(s)
            p = p * pl.reciprocal(jnp.sum(p, axis=-1, keepdims=True), approx=True)
            og = jnp.dot(p.astype(mmdt), vg, preferred_element_type=f32)   # (n_rep*NL, HD)
            for r in range(n_rep):
                head_out[g * n_rep + r] = og[r * NL:(r + 1) * NL, :]       # (NL, HD)

        # lane-dense assembly of attention output, then single o_proj matmul
        attn = jnp.concatenate(head_out, axis=-1)                          # (NL, NH*HD)
        attn_out = jnp.dot(attn.astype(mmdt), wo_ref[...],
                           preferred_element_type=f32)                     # (NL, H)

        # residual add
        lat1 = lat + attn_out

        # post-attention RMSNorm + fused gate/up SiLU MLP + residual
        h1 = _rms_norm_f32(lat1, wln_post_ref[...], eps)
        gu = jnp.dot(h1.astype(mmdt), wgu_ref[...],
                     preferred_element_type=f32)                           # (NL, 2*INTER)
        g_act = gu[:, :INTER]
        u = gu[:, INTER:]
        act = g_act * jax.nn.sigmoid(g_act)                                # SiLU (f32)
        mlp = jnp.dot((act * u).astype(mmdt), wd_ref[...],
                      preferred_element_type=f32)                          # (NL, H)

        out_ref[0] = (lat1 + mlp).astype(out_ref.dtype)

    return kernel


# ----------------------------- wrapper ---------------------------------------

_MM_ORDER = ("wq", "wk", "wv", "wo", "wgu", "wd")


def idefics2_perceiver_layer(latents, context, params, *,
                             num_heads, head_dim, num_kv_heads, eps=1e-6,
                             vmem_limit_bytes=None):
    assert num_heads % num_kv_heads == 0
    B, NL, H = latents.shape
    _, S, _ = context.shape
    INTER = params["wg"].shape[1]

    # Norm weights stay f32 (used in f32 elementwise math); matmul weights bf16.
    norms = {k: params[k].astype(jnp.float32)
             for k in ("w_ln_latents", "w_ln_context", "w_ln_post")}
    mm = {
        "wq": params["wq"], "wk": params["wk"], "wv": params["wv"],
        "wo": params["wo"],
        # fused gate+up projection: one [H, 2*INTER] weight, one MXU call
        "wgu": jnp.concatenate([params["wg"], params["wu"]], axis=1),
        "wd": params["wd"],
    }
    mm = {k: v.astype(jnp.bfloat16) for k, v in mm.items()}

    kernel = _make_kernel(NL, S, H, num_heads, head_dim, num_kv_heads, INTER, eps)

    def _full_spec(arr):
        zeros = (0,) * arr.ndim
        return pl.BlockSpec(arr.shape, lambda b: zeros)

    in_specs = [
        pl.BlockSpec((1, NL, H), lambda b: (b, 0, 0)),   # latents (per batch item)
        pl.BlockSpec((1, S, H), lambda b: (b, 0, 0)),    # context (per batch item)
        _full_spec(norms["w_ln_latents"]),
        _full_spec(norms["w_ln_context"]),
        _full_spec(norms["w_ln_post"]),
    ] + [_full_spec(mm[name]) for name in _MM_ORDER]

    out_spec = pl.BlockSpec((1, NL, H), lambda b: (b, 0, 0))

    grid_spec = pltpu.PrefetchScalarGridSpec(
        num_scalar_prefetch=0,
        grid=(B,),
        in_specs=in_specs,
        out_specs=out_spec,
    )

    fn = pl.pallas_call(
        kernel,
        out_shape=jax.ShapeDtypeStruct((B, NL, H), latents.dtype),
        grid_spec=grid_spec,
        compiler_params=pltpu.CompilerParams(
            dimension_semantics=("parallel",),
            vmem_limit_bytes=vmem_limit_bytes),
    )
    args = (latents, context,
            norms["w_ln_latents"], norms["w_ln_context"], norms["w_ln_post"]
            ) + tuple(mm[name] for name in _MM_ORDER)
    return fn(*args)


# ----------------------------- pure-JAX reference ----------------------------

def ref_layer(latents, context, p, *, num_heads, head_dim, num_kv_heads, eps=1e-6):
    def rms(x, w):
        var = jnp.mean(x * x, axis=-1, keepdims=True)
        return x * jax.lax.rsqrt(var + eps) * w

    B, NL, H = latents.shape
    S = context.shape[1]
    KV = S + NL
    n_rep = num_heads // num_kv_heads

    residual = latents
    lat_n = rms(latents, p["w_ln_latents"][0])
    ctx_n = rms(context, p["w_ln_context"][0])
    hidden = jnp.concatenate([ctx_n, lat_n], axis=1)               # (B, KV, H)

    q = lat_n @ p["wq"]                                            # (B, NL, NH*HD)
    k = hidden @ p["wk"]                                           # (B, KV, NKV*HD)
    v = hidden @ p["wv"]

    q = q.reshape(B, NL, num_heads, head_dim).transpose(0, 2, 1, 3)
    k = k.reshape(B, KV, num_kv_heads, head_dim).transpose(0, 2, 1, 3)
    v = v.reshape(B, KV, num_kv_heads, head_dim).transpose(0, 2, 1, 3)
    k = jnp.repeat(k, n_rep, axis=1)
    v = jnp.repeat(v, n_rep, axis=1)

    w = jnp.einsum('bhqd,bhkd->bhqk', q, k) / math.sqrt(head_dim)
    w = jax.nn.softmax(w.astype(jnp.float32), axis=-1)
    o = jnp.einsum('bhqk,bhkd->bhqd', w, v)
    o = o.transpose(0, 2, 1, 3).reshape(B, NL, num_heads * head_dim)
    o = o @ p["wo"]

    lat1 = residual + o
    h1 = rms(lat1, p["w_ln_post"][0])
    g = h1 @ p["wg"]
    u = h1 @ p["wu"]
    mlp = (jax.nn.silu(g) * u) @ p["wd"]
    return lat1 + mlp


# ----------------------------- main -------------------------------------------

if __name__ == "__main__":
    # Small config consistent with the module:
    #   hidden_size H = 32, resampler_n_latents NL = 8, context seq S = 16
    #   resampler_n_heads = 4, resampler_head_dim = 8, num_key_value_heads = 2
    #   intermediate_size = 4 * H = 128, hidden_act = "silu"
    B, NL, S, H = 2, 8, 16, 32
    NH, HD, NKV = 4, 8, 2
    INTER = 4 * H
    EPS = 1e-6

    key = jax.random.PRNGKey(0)
    keys = jax.random.split(key, 16)

    def nrm(k, shape, scale=0.05):
        return (scale * jax.random.normal(k, shape)).astype(jnp.float32)

    latents = nrm(keys[0], (B, NL, H), 1.0)
    context = nrm(keys[1], (B, S, H), 1.0)

    params = {
        "w_ln_latents": (1.0 + 0.1 * jax.random.normal(keys[2], (1, H))).astype(jnp.float32),
        "w_ln_context": (1.0 + 0.1 * jax.random.normal(keys[3], (1, H))).astype(jnp.float32),
        "w_ln_post":    (1.0 + 0.1 * jax.random.normal(keys[4], (1, H))).astype(jnp.float32),
        "wq": nrm(keys[5], (H, NH * HD)),
        "wk": nrm(keys[6], (H, NKV * HD)),
        "wv": nrm(keys[7], (H, NKV * HD)),
        "wo": nrm(keys[8], (NH * HD, H)),
        "wg": nrm(keys[9], (H, INTER)),
        "wu": nrm(keys[10], (H, INTER)),
        "wd": nrm(keys[11], (INTER, H)),
    }

    out = idefics2_perceiver_layer(
        latents, context, params,
        num_heads=NH, head_dim=HD, num_kv_heads=NKV, eps=EPS)
    out = jax.block_until_ready(out)

    expected = ref_layer(latents, context, params,
                         num_heads=NH, head_dim=HD, num_kv_heads=NKV, eps=EPS)
    expected = jax.block_until_ready(expected)

    # Tolerance relaxed vs the f32 reference: kernel uses bf16 matmul operands
    # (f32 accumulation) and an approx-reciprocal softmax denominator.
    np.testing.assert_allclose(np.asarray(out), np.asarray(expected),
                               rtol=2e-2, atol=2e-2)
    print("KERNEL_OK")
</pallas_src>

<mosaic_0001>
module attributes {stable_mosaic.version = 11 : i64} {
  func.func @kernel(%arg0: i32, %arg1: memref<1x8x32xf32, #tpu.memory_space<vmem>>, %arg2: memref<1x16x32xf32, #tpu.memory_space<vmem>>, %arg3: memref<1x32xf32, #tpu.memory_space<vmem>>, %arg4: memref<1x32xf32, #tpu.memory_space<vmem>>, %arg5: memref<1x32xf32, #tpu.memory_space<vmem>>, %arg6: memref<32x32xbf16, #tpu.memory_space<vmem>>, %arg7: memref<32x16xbf16, #tpu.memory_space<vmem>>, %arg8: memref<32x16xbf16, #tpu.memory_space<vmem>>, %arg9: memref<32x32xbf16, #tpu.memory_space<vmem>>, %arg10: memref<32x256xbf16, #tpu.memory_space<vmem>>, %arg11: memref<128x32xbf16, #tpu.memory_space<vmem>>, %arg12: memref<1x8x32xf32, #tpu.memory_space<vmem>>) attributes {dimension_semantics = [#tpu.dimension_semantics<parallel>], iteration_bounds = array<i64: 2>, scalar_prefetch = 0 : i64, scratch_operands = 0 : i64, tpu.core_type = #tpu.core_type<tc>, window_params = [{transform_indices = @transform_0, window_bounds = array<i64: 1, 8, 32>}, {transform_indices = @transform_1, window_bounds = array<i64: 1, 16, 32>}, {pipeline_mode = #tpu.pipeline_mode<synchronous>, transform_indices = @transform_2, window_bounds = array<i64: 1, 32>}, {pipeline_mode = #tpu.pipeline_mode<synchronous>, transform_indices = @transform_3, window_bounds = array<i64: 1, 32>}, {pipeline_mode = #tpu.pipeline_mode<synchronous>, transform_indices = @transform_4, window_bounds = array<i64: 1, 32>}, {pipeline_mode = #tpu.pipeline_mode<synchronous>, transform_indices = @transform_5, window_bounds = array<i64: 32, 32>}, {pipeline_mode = #tpu.pipeline_mode<synchronous>, transform_indices = @transform_6, window_bounds = array<i64: 32, 16>}, {pipeline_mode = #tpu.pipeline_mode<synchronous>, transform_indices = @transform_7, window_bounds = array<i64: 32, 16>}, {pipeline_mode = #tpu.pipeline_mode<synchronous>, transform_indices = @transform_8, window_bounds = array<i64: 32, 32>}, {pipeline_mode = #tpu.pipeline_mode<synchronous>, transform_indices = @transform_9, window_bounds = array<i64: 32, 256>}, {pipeline_mode = #tpu.pipeline_mode<synchronous>, transform_indices = @transform_10, window_bounds = array<i64: 128, 32>}, {transform_indices = @transform_11, window_bounds = array<i64: 1, 8, 32>}]} {
    %c0 = arith.constant 0 : index
    %c0_0 = arith.constant 0 : index
    %c0_1 = arith.constant 0 : index
    %0 = vector.load %arg1[%c0, %c0_0, %c0_1] : memref<1x8x32xf32, #tpu.memory_space<vmem>>, vector<1x8x32xf32>
    %1 = vector.shape_cast %0 : vector<1x8x32xf32> to vector<8x32xf32>
    %c0_2 = arith.constant 0 : index
    %c0_3 = arith.constant 0 : index
    %c0_4 = arith.constant 0 : index
    %2 = vector.load %arg2[%c0_2, %c0_3, %c0_4] : memref<1x16x32xf32, #tpu.memory_space<vmem>>, vector<1x16x32xf32>
    %3 = vector.shape_cast %2 : vector<1x16x32xf32> to vector<16x32xf32>
    %c0_5 = arith.constant 0 : index
    %c0_6 = arith.constant 0 : index
    %4 = vector.load %arg3[%c0_5, %c0_6] : memref<1x32xf32, #tpu.memory_space<vmem>>, vector<1x32xf32>
    %5 = arith.mulf %1, %1 : vector<8x32xf32>
    %cst = arith.constant dense<0.000000e+00> : vector<8xf32>
    %6 = vector.multi_reduction <add>, %5, %cst [1] : vector<8x32xf32> to vector<8xf32>
    %7 = vector.shape_cast %6 : vector<8xf32> to vector<8x1xf32>
    %cst_7 = arith.constant 3.200000e+01 : f32
    %8 = vector.broadcast %cst_7 : f32 to vector<8x1xf32>
    %9 = arith.divf %7, %8 : vector<8x1xf32>
    %cst_8 = arith.constant 9.99999997E-7 : f32
    %10 = vector.broadcast %cst_8 : f32 to vector<8x1xf32>
    %11 = arith.addf %9, %10 : vector<8x1xf32>
    %12 = math.rsqrt %11 : vector<8x1xf32>
    %13 = vector.broadcast %12 : vector<8x1xf32> to vector<8x32xf32>
    %14 = arith.mulf %1, %13 : vector<8x32xf32>
    %15 = vector.broadcast %4 : vector<1x32xf32> to vector<8x32xf32>
    %16 = arith.mulf %14, %15 : vector<8x32xf32>
    %c0_9 = arith.constant 0 : index
    %c0_10 = arith.constant 0 : index
    %17 = vector.load %arg4[%c0_9, %c0_10] : memref<1x32xf32, #tpu.memory_space<vmem>>, vector<1x32xf32>
    %18 = arith.mulf %3, %3 : vector<16x32xf32>
    %cst_11 = arith.constant dense<0.000000e+00> : vector<16xf32>
    %19 = vector.multi_reduction <add>, %18, %cst_11 [1] : vector<16x32xf32> to vector<16xf32>
    %20 = vector.shape_cast %19 : vector<16xf32> to vector<16x1xf32>
    %cst_12 = arith.constant 3.200000e+01 : f32
    %21 = vector.broadcast %cst_12 : f32 to vector<16x1xf32>
    %22 = arith.divf %20, %21 : vector<16x1xf32>
    %cst_13 = arith.constant 9.99999997E-7 : f32
    %23 = vector.broadcast %cst_13 : f32 to vector<16x1xf32>
    %24 = arith.addf %22, %23 : vector<16x1xf32>
    %25 = math.rsqrt %24 : vector<16x1xf32>
    %26 = vector.broadcast %25 : vector<16x1xf32> to vector<16x32xf32>
    %27 = arith.mulf %3, %26 : vector<16x32xf32>
    %28 = vector.broadcast %17 : vector<1x32xf32> to vector<16x32xf32>
    %29 = arith.mulf %27, %28 : vector<16x32xf32>
    %30 = tpu.concatenate %29, %16 in 0 : vector<16x32xf32>, vector<8x32xf32> -> vector<24x32xf32>
    %31 = arith.truncf %30 : vector<24x32xf32> to vector<24x32xbf16>
    %32 = arith.truncf %16 : vector<8x32xf32> to vector<8x32xbf16>
    %c0_14 = arith.constant 0 : index
    %c0_15 = arith.constant 0 : index
    %33 = vector.load %arg6[%c0_14, %c0_15] : memref<32x32xbf16, #tpu.memory_space<vmem>>, vector<32x32xbf16>
    %cst_16 = arith.constant dense<0.000000e+00> : vector<8x32xf32>
    %34 = tpu.matmul %32, %33, %cst_16 {dimension_numbers = #tpu.dot_dimension_numbers<[1], [0], [0], [1], [0, 0, 1, 1], [], []>} : vector<8x32xbf16>, vector<32x32xbf16>, vector<8x32xf32> -> vector<8x32xf32>
    %c0_17 = arith.constant 0 : index
    %c0_18 = arith.constant 0 : index
    %35 = vector.load %arg7[%c0_17, %c0_18] : memref<32x16xbf16, #tpu.memory_space<vmem>>, vector<32x16xbf16>
    %cst_19 = arith.constant dense<0.000000e+00> : vector<24x16xf32>
    %36 = tpu.matmul %31, %35, %cst_19 {dimension_numbers = #tpu.dot_dimension_numbers<[1], [0], [0], [1], [0, 0, 1, 1], [], []>} : vector<24x32xbf16>, vector<32x16xbf16>, vector<24x16xf32> -> vector<24x16xf32>
    %c0_20 = arith.constant 0 : index
    %c0_21 = arith.constant 0 : index
    %37 = vector.load %arg8[%c0_20, %c0_21] : memref<32x16xbf16, #tpu.memory_space<vmem>>, vector<32x16xbf16>
    %cst_22 = arith.constant dense<0.000000e+00> : vector<24x16xf32>
    %38 = tpu.matmul %31, %37, %cst_22 {dimension_numbers = #tpu.dot_dimension_numbers<[1], [0], [0], [1], [0, 0, 1, 1], [], []>} : vector<24x32xbf16>, vector<32x16xbf16>, vector<24x16xf32> -> vector<24x16xf32>
    %39 = vector.extract_strided_slice %34 {offsets = [0, 0], sizes = [8, 8], strides = [1, 1]} : vector<8x32xf32> to vector<8x8xf32>
    %40 = vector.extract_strided_slice %34 {offsets = [0, 8], sizes = [8, 8], strides = [1, 1]} : vector<8x32xf32> to vector<8x8xf32>
    %41 = vector.extract_strided_slice %34 {offsets = [0, 16], sizes = [8, 8], strides = [1, 1]} : vector<8x32xf32> to vector<8x8xf32>
    %42 = vector.extract_strided_slice %34 {offsets = [0, 24], sizes = [8, 8], strides = [1, 1]} : vector<8x32xf32> to vector<8x8xf32>
    %43 = tpu.concatenate %39, %40, %41, %42 in 0 : vector<8x8xf32>, vector<8x8xf32>, vector<8x8xf32>, vector<8x8xf32> -> vector<32x8xf32>
    %44 = arith.truncf %43 : vector<32x8xf32> to vector<32x8xbf16>
    %45 = vector.extract_strided_slice %44 {offsets = [0, 0], sizes = [16, 8], strides = [1, 1]} : vector<32x8xbf16> to vector<16x8xbf16>
    %46 = vector.extract_strided_slice %36 {offsets = [0, 0], sizes = [24, 8], strides = [1, 1]} : vector<24x16xf32> to vector<24x8xf32>
    %47 = arith.truncf %46 : vector<24x8xf32> to vector<24x8xbf16>
    %48 = vector.extract_strided_slice %38 {offsets = [0, 0], sizes = [24, 8], strides = [1, 1]} : vector<24x16xf32> to vector<24x8xf32>
    %49 = arith.truncf %48 : vector<24x8xf32> to vector<24x8xbf16>
    "tpu.trace_start"() <{level = 10 : i32, message = "nd,kd->nk"}> : () -> ()
    %cst_23 = arith.constant dense<0.000000e+00> : vector<16x24xf32>
    %50 = tpu.matmul %45, %47, %cst_23 {dimension_numbers = #tpu.dot_dimension_numbers<[1], [1], [0], [0], [0, 0, 1, 0], [], []>} : vector<16x8xbf16>, vector<24x8xbf16>, vector<16x24xf32> -> vector<16x24xf32>
    "tpu.trace_stop"() : () -> ()
    %cst_24 = arith.constant 0.353553385 : f32
    %51 = vector.broadcast %cst_24 : f32 to vector<16x24xf32>
    %52 = arith.mulf %50, %51 : vector<16x24xf32>
    %cst_25 = arith.constant dense<0xFF800000> : vector<16xf32>
    %53 = vector.multi_reduction <maximumf>, %52, %cst_25 [1] : vector<16x24xf32> to vector<16xf32>
    %54 = vector.shape_cast %53 : vector<16xf32> to vector<16x1xf32>
    %55 = vector.broadcast %54 : vector<16x1xf32> to vector<16x24xf32>
    %56 = arith.subf %52, %55 : vector<16x24xf32>
    %57 = math.exp %56 : vector<16x24xf32>
    %cst_26 = arith.constant dense<0.000000e+00> : vector<16xf32>
    %58 = vector.multi_reduction <add>, %57, %cst_26 [1] : vector<16x24xf32> to vector<16xf32>
    %59 = vector.shape_cast %58 : vector<16xf32> to vector<16x1xf32>
    %60 = tpu.reciprocal %59 {approx = true} : vector<16x1xf32> -> vector<16x1xf32>
    %61 = vector.broadcast %60 : vector<16x1xf32> to vector<16x24xf32>
    %62 = arith.mulf %57, %61 : vector<16x24xf32>
    %63 = arith.truncf %62 : vector<16x24xf32> to vector<16x24xbf16>
    %cst_27 = arith.constant dense<0.000000e+00> : vector<16x8xf32>
    %64 = tpu.matmul %63, %49, %cst_27 {dimension_numbers = #tpu.dot_dimension_numbers<[1], [0], [0], [1], [0, 0, 1, 1], [], []>} : vector<16x24xbf16>, vector<24x8xbf16>, vector<16x8xf32> -> vector<16x8xf32>
    %65 = vector.extract_strided_slice %64 {offsets = [0, 0], sizes = [8, 8], strides = [1, 1]} : vector<16x8xf32> to vector<8x8xf32>
    %66 = vector.extract_strided_slice %64 {offsets = [8, 0], sizes = [8, 8], strides = [1, 1]} : vector<16x8xf32> to vector<8x8xf32>
    %67 = vector.extract_strided_slice %44 {offsets = [16, 0], sizes = [16, 8], strides = [1, 1]} : vector<32x8xbf16> to vector<16x8xbf16>
    %68 = vector.extract_strided_slice %36 {offsets = [0, 8], sizes = [24, 8], strides = [1, 1]} : vector<24x16xf32> to vector<24x8xf32>
    %69 = arith.truncf %68 : vector<24x8xf32> to vector<24x8xbf16>
    %70 = vector.extract_strided_slice %38 {offsets = [0, 8], sizes = [24, 8], strides = [1, 1]} : vector<24x16xf32> to vector<24x8xf32>
    %71 = arith.truncf %70 : vector<24x8xf32> to vector<24x8xbf16>
    "tpu.trace_start"() <{level = 10 : i32, message = "nd,kd->nk"}> : () -> ()
    %cst_28 = arith.constant dense<0.000000e+00> : vector<16x24xf32>
    %72 = tpu.matmul %67, %69, %cst_28 {dimension_numbers = #tpu.dot_dimension_numbers<[1], [1], [0], [0], [0, 0, 1, 0], [], []>} : vector<16x8xbf16>, vector<24x8xbf16>, vector<16x24xf32> -> vector<16x24xf32>
    "tpu.trace_stop"() : () -> ()
    %cst_29 = arith.constant 0.353553385 : f32
    %73 = vector.broadcast %cst_29 : f32 to vector<16x24xf32>
    %74 = arith.mulf %72, %73 : vector<16x24xf32>
    %cst_30 = arith.constant dense<0xFF800000> : vector<16xf32>
    %75 = vector.multi_reduction <maximumf>, %74, %cst_30 [1] : vector<16x24xf32> to vector<16xf32>
    %76 = vector.shape_cast %75 : vector<16xf32> to vector<16x1xf32>
    %77 = vector.broadcast %76 : vector<16x1xf32> to vector<16x24xf32>
    %78 = arith.subf %74, %77 : vector<16x24xf32>
    %79 = math.exp %78 : vector<16x24xf32>
    %cst_31 = arith.constant dense<0.000000e+00> : vector<16xf32>
    %80 = vector.multi_reduction <add>, %79, %cst_31 [1] : vector<16x24xf32> to vector<16xf32>
    %81 = vector.shape_cast %80 : vector<16xf32> to vector<16x1xf32>
    %82 = tpu.reciprocal %81 {approx = true} : vector<16x1xf32> -> vector<16x1xf32>
    %83 = vector.broadcast %82 : vector<16x1xf32> to vector<16x24xf32>
    %84 = arith.mulf %79, %83 : vector<16x24xf32>
    %85 = arith.truncf %84 : vector<16x24xf32> to vector<16x24xbf16>
    %cst_32 = arith.constant dense<0.000000e+00> : vector<16x8xf32>
    %86 = tpu.matmul %85, %71, %cst_32 {dimension_numbers = #tpu.dot_dimension_numbers<[1], [0], [0], [1], [0, 0, 1, 1], [], []>} : vector<16x24xbf16>, vector<24x8xbf16>, vector<16x8xf32> -> vector<16x8xf32>
    %87 = vector.extract_strided_slice %86 {offsets = [0, 0], sizes = [8, 8], strides = [1, 1]} : vector<16x8xf32> to vector<8x8xf32>
    %88 = vector.extract_strided_slice %86 {offsets = [8, 0], sizes = [8, 8], strides = [1, 1]} : vector<16x8xf32> to vector<8x8xf32>
    %89 = tpu.concatenate %65, %66, %87, %88 in 1 : vector<8x8xf32>, vector<8x8xf32>, vector<8x8xf32>, vector<8x8xf32> -> vector<8x32xf32>
    %90 = arith.truncf %89 : vector<8x32xf32> to vector<8x32xbf16>
    %c0_33 = arith.constant 0 : index
    %c0_34 = arith.constant 0 : index
    %91 = vector.load %arg9[%c0_33, %c0_34] : memref<32x32xbf16, #tpu.memory_space<vmem>>, vector<32x32xbf16>
    %cst_35 = arith.constant dense<0.000000e+00> : vector<8x32xf32>
    %92 = tpu.matmul %90, %91, %cst_35 {dimension_numbers = #tpu.dot_dimension_numbers<[1], [0], [0], [1], [0, 0, 1, 1], [], []>} : vector<8x32xbf16>, vector<32x32xbf16>, vector<8x32xf32> -> vector<8x32xf32>
    %93 = arith.addf %1, %92 : vector<8x32xf32>
    %c0_36 = arith.constant 0 : index
    %c0_37 = arith.constant 0 : index
    %94 = vector.load %arg5[%c0_36, %c0_37] : memref<1x32xf32, #tpu.memory_space<vmem>>, vector<1x32xf32>
    %95 = arith.mulf %93, %93 : vector<8x32xf32>
    %cst_38 = arith.constant dense<0.000000e+00> : vector<8xf32>
    %96 = vector.multi_reduction <add>, %95, %cst_38 [1] : vector<8x32xf32> to vector<8xf32>
    %97 = vector.shape_cast %96 : vector<8xf32> to vector<8x1xf32>
    %cst_39 = arith.constant 3.200000e+01 : f32
    %98 = vector.broadcast %cst_39 : f32 to vector<8x1xf32>
    %99 = arith.divf %97, %98 : vector<8x1xf32>
    %cst_40 = arith.constant 9.99999997E-7 : f32
    %100 = vector.broadcast %cst_40 : f32 to vector<8x1xf32>
    %101 = arith.addf %99, %100 : vector<8x1xf32>
    %102 = math.rsqrt %101 : vector<8x1xf32>
    %103 = vector.broadcast %102 : vector<8x1xf32> to vector<8x32xf32>
    %104 = arith.mulf %93, %103 : vector<8x32xf32>
    %105 = vector.broadcast %94 : vector<1x32xf32> to vector<8x32xf32>
    %106 = arith.mulf %104, %105 : vector<8x32xf32>
    %107 = arith.truncf %106 : vector<8x32xf32> to vector<8x32xbf16>
    %c0_41 = arith.constant 0 : index
    %c0_42 = arith.constant 0 : index
    %108 = vector.load %arg10[%c0_41, %c0_42] : memref<32x256xbf16, #tpu.memory_space<vmem>>, vector<32x256xbf16>
    %cst_43 = arith.constant dense<0.000000e+00> : vector<8x256xf32>
    %109 = tpu.matmul %107, %108, %cst_43 {dimension_numbers = #tpu.dot_dimension_numbers<[1], [0], [0], [1], [0, 0, 1, 1], [], []>} : vector<8x32xbf16>, vector<32x256xbf16>, vector<8x256xf32> -> vector<8x256xf32>
    %110 = vector.extract_strided_slice %109 {offsets = [0, 0], sizes = [8, 128], strides = [1, 1]} : vector<8x256xf32> to vector<8x128xf32>
    %111 = vector.extract_strided_slice %109 {offsets = [0, 128], sizes = [8, 128], strides = [1, 1]} : vector<8x256xf32> to vector<8x128xf32>
    %112 = arith.negf %110 : vector<8x128xf32>
    %113 = math.exp %112 : vector<8x128xf32>
    %cst_44 = arith.constant 1.000000e+00 : f32
    %114 = vector.broadcast %cst_44 : f32 to vector<8x128xf32>
    %115 = arith.addf %114, %113 : vector<8x128xf32>
    %116 = arith.divf %114, %115 : vector<8x128xf32>
    %117 = arith.mulf %110, %116 : vector<8x128xf32>
    %118 = arith.mulf %117, %111 : vector<8x128xf32>
    %119 = arith.truncf %118 : vector<8x128xf32> to vector<8x128xbf16>
    %c0_45 = arith.constant 0 : index
    %c0_46 = arith.constant 0 : index
    %120 = vector.load %arg11[%c0_45, %c0_46] : memref<128x32xbf16, #tpu.memory_space<vmem>>, vector<128x32xbf16>
    %cst_47 = arith.constant dense<0.000000e+00> : vector<8x32xf32>
    %121 = tpu.matmul %119, %120, %cst_47 {dimension_numbers = #tpu.dot_dimension_numbers<[1], [0], [0], [1], [0, 0, 1, 1], [], []>} : vector<8x128xbf16>, vector<128x32xbf16>, vector<8x32xf32> -> vector<8x32xf32>
    %122 = arith.addf %93, %121 : vector<8x32xf32>
    %c0_48 = arith.constant 0 : index
    %c0_49 = arith.constant 0 : index
    %c0_50 = arith.constant 0 : index
    %123 = vector.load %arg12[%c0_48, %c0_49, %c0_50] : memref<1x8x32xf32, #tpu.memory_space<vmem>>, vector<1x8x32xf32>
    %124 = vector.shape_cast %123 : vector<1x8x32xf32> to vector<8x32xf32>
    %125 = vector.shape_cast %122 : vector<8x32xf32> to vector<1x8x32xf32>
    tpu.vector_store %arg12[%c0_48, %c0_49, %c0_50], %125 {strides = array<i32>} : memref<1x8x32xf32, #tpu.memory_space<vmem>>, vector<1x8x32xf32>,
    return
  }
  func.func @transform_0(%arg0: i32) -> (i32, i32, i32) {
    %c0_i32 = arith.constant 0 : i32
    %c0_i32_0 = arith.constant 0 : i32
    %c0_i32_1 = arith.constant 0 : i32
    return %arg0, %c0_i32, %c0_i32_0 : i32, i32, i32
  }
  func.func @transform_1(%arg0: i32) -> (i32, i32, i32) {
    %c0_i32 = arith.constant 0 : i32
    %c0_i32_0 = arith.constant 0 : i32
    %c0_i32_1 = arith.constant 0 : i32
    return %arg0, %c0_i32, %c0_i32_0 : i32, i32, i32
  }
  func.func @transform_2(%arg0: i32) -> (i32, i32) {
    %c0_i32 = arith.constant 0 : i32
    %c0_i32_0 = arith.constant 0 : i32
    %c0_i32_1 = arith.constant 0 : i32
    return %c0_i32, %c0_i32_0 : i32, i32
  }
  func.func @transform_3(%arg0: i32) -> (i32, i32) {
    %c0_i32 = arith.constant 0 : i32
    %c0_i32_0 = arith.constant 0 : i32
    %c0_i32_1 = arith.constant 0 : i32
    return %c0_i32, %c0_i32_0 : i32, i32
  }
  func.func @transform_4(%arg0: i32) -> (i32, i32) {
    %c0_i32 = arith.constant 0 : i32
    %c0_i32_0 = arith.constant 0 : i32
    %c0_i32_1 = arith.constant 0 : i32
    return %c0_i32, %c0_i32_0 : i32, i32
  }
  func.func @transform_5(%arg0: i32) -> (i32, i32) {
    %c0_i32 = arith.constant 0 : i32
    %c0_i32_0 = arith.constant 0 : i32
    %c0_i32_1 = arith.constant 0 : i32
    return %c0_i32, %c0_i32_0 : i32, i32
  }
  func.func @transform_6(%arg0: i32) -> (i32, i32) {
    %c0_i32 = arith.constant 0 : i32
    %c0_i32_0 = arith.constant 0 : i32
    %c0_i32_1 = arith.constant 0 : i32
    return %c0_i32, %c0_i32_0 : i32, i32
  }
  func.func @transform_7(%arg0: i32) -> (i32, i32) {
    %c0_i32 = arith.constant 0 : i32
    %c0_i32_0 = arith.constant 0 : i32
    %c0_i32_1 = arith.constant 0 : i32
    return %c0_i32, %c0_i32_0 : i32, i32
  }
  func.func @transform_8(%arg0: i32) -> (i32, i32) {
    %c0_i32 = arith.constant 0 : i32
    %c0_i32_0 = arith.constant 0 : i32
    %c0_i32_1 = arith.constant 0 : i32
    return %c0_i32, %c0_i32_0 : i32, i32
  }
  func.func @transform_9(%arg0: i32) -> (i32, i32) {
    %c0_i32 = arith.constant 0 : i32
    %c0_i32_0 = arith.constant 0 : i32
    %c0_i32_1 = arith.constant 0 : i32
    return %c0_i32, %c0_i32_0 : i32, i32
  }
  func.func @transform_10(%arg0: i32) -> (i32, i32) {
    %c0_i32 = arith.constant 0 : i32
    %c0_i32_0 = arith.constant 0 : i32
    %c0_i32_1 = arith.constant 0 : i32
    return %c0_i32, %c0_i32_0 : i32, i32
  }
  func.func @transform_11(%arg0: i32) -> (i32, i32, i32) {
    %c0_i32 = arith.constant 0 : i32
    %c0_i32_0 = arith.constant 0 : i32
    %c0_i32_1 = arith.constant 0 : i32
    return %arg0, %c0_i32, %c0_i32_0 : i32, i32, i32
  }
}

</mosaic_0001>

<bundles_post_ra>
// kernel: tpu_custom_call.1
= control target key start
LH: loop header
LB: loop body
LE: loop exit
PB: predicated region body
PF: predicated region fallthrough
CT: control target
= control target key end

     0   :  { %16 = vsyncpa [#allocation3], 0  ;;  %s2047_s0 = inlined_call_operand.vmem [shape: f32[2,8,32], index: 0, kind: input, shape index: {}]   ;;  %s2048_s1 = inlined_call_operand.vmem [shape: f32[2,16,32], index: 1, kind: input, shape index: {}]   ;;  %s2049_s2 = inlined_call_operand.vmem [shape: f32[1,32], index: 2, kind: input, shape index: {}]   ;;  %s2050_s3 = inlined_call_operand.vmem [shape: f32[1,32], index: 3, kind: input, shape index: {}]   ;;  %s2051_s4 = inlined_call_operand.hbm [shape: f32[1,32], index: 4, kind: input, shape index: {}]   ;;  %s2052_s5 = inlined_call_operand.vmem [shape: bf16[32,32], index: 5, kind: input, shape index: {}]   ;;  %s2053_s6 = inlined_call_operand.vmem [shape: bf16[32,16], index: 6, kind: input, shape index: {}]   ;;  %s2054_s7 = inlined_call_operand.vmem [shape: bf16[32,16], index: 7, kind: input, shape index: {}]   ;;  %s2055_s8 = inlined_call_operand.vmem [shape: bf16[32,32], index: 8, kind: input, shape index: {}]   ;;  %s2056_s9 = inlined_call_operand.vmem [shape: bf16[32,256], index: 9, kind: input, shape index: {}]   ;;  %s2057_s10 = inlined_call_operand.vmem [shape: bf16[128,32], index: 10, kind: input, shape index: {}]   ;;  %s2058_s11 = inlined_call_operand.hbm [shape: f32[2,8,32], index: 11, kind: output, shape index: {}]  }
   0x1   :  { %17 = vsyncpa [#allocation4], 0 }
   0x2   :  { %19 = vsyncpa [#allocation4 + $0x1], 0  ;;  %s1749_s17 = smov 0   ;;  %s1751_s18 = smov 0  }
   0x3   :  { %s1753_s19 = smov 0   ;;  %s1755_s20 = smov 0  }
   0x4 LB: > { %s1770_s21 = sadd.s32 4294967295, %s1676_s20   ;;  %s1304_s22 = sadd.s32 4294967294, %s1676_s20   ;;  %s1676_s20 = sphi %s1755_s20, %s2076_s20   ;;  %s1672_s19 = sphi %s1753_s19, %s2075_s19   ;;  %s1668_s18 = sphi %s1751_s18, %s2074_s18   ;;  %s1664_s17 = sphi %s1749_s17, %s2073_s17  }
   0x5   : > { %s1774_s23 = sadd.s32 1, %s1676_s20   ;;  %s273_s24 = sadd.s32 1, %s1672_s19 }
   0x6   : > { %s270_s25 = ssub.s32 %s1676_s20, %s1774_s23  ;;  %p283_p0 = scmp.ne.s32.totalorder %s1672_s19, %s1668_s18 }
   0x7   : > { %p271_p1 = scmp.eq.s32.totalorder %s270_s25, 0  ;;  %p284_p2 = scmp.eq.s32.totalorder %s1770_s21, 1 }
   0x8   : > { %p289_p3 = scmp.ne.s32.totalorder %s1668_s18, %s1664_s17  ;;  %p290_p4 = scmp.eq.s32.totalorder %s1304_s22, 1 }
   0x9   : > { %s1785_s26 = scalar_select %p271_p1, %s1672_s19, %s273_s24  }
   0xa   : > { %p1787_p5 = por %p284_p2, %p283_p0  ;;  %p1791_p6 = por %p290_p4, %p289_p3 }
   0xb   : > { %2062 = sst [smem:[#allocation8_spill]] %s1785_s26  ;;  %p1305_p7 = scmp.ge.s32.totalorder %s1676_s20, 1 }
   0xc   : > { %s2063_s27 = scalar_select %p1787_p5, 1, 0 }
   0xd   : > { %s2064_s28 = scalar_select %p1791_p6, 1, 0 }
   0xe   : > { %p297_p8 = scmp.lt.s32.totalorder %s1676_s20, 3  ;;  %p2059_p9 = scmp.eq.s32.totalorder %s1770_s21, 0 }
   0xf   : > { %s1678_s30 = smov [#allocation2]   ;;  %s1582_s16 = scalar_lea.hbm %s2051_s4, 16 }
  0x10   : > { %p1798_p10 = pnand %p1305_p7, %p297_p8  ;;  %s316_s12 = sshll.u32 %s1678_s30, 4  ;;  %s317_s12 = int_to_ptr.vmem [resolvable:$true] %s316_s12 }
  0x11   : > { %p1583_p13 = scmp.ne.s32.totalorder %s2051_s4, %s1582_s16  ;;  %p1589_p3 = scmp.lt.u32.totalorder %s1582_s16, %s2051_s4 }
  0x12   : > { %s2065_s29 = scalar_select %p1798_p10, 1, 0 }
  0x13   : > { %p1479_p11 = pneg %p1798_p10 }
  0x15   : > { %p1806_p12 = pnand %p2059_p9, %p1479_p11 }
  0x17   : > { %p1584_p0 = pneg %p1806_p12 }
  0x19   : > { %p1585_p1 = pnand %p1584_p0, %p1583_p13 }
  0x1b   : > { %p1586_p2 = pneg %p1585_p1 }
  0x1d   : > { %p1591_p4 = pnand %p1589_p3, %p1586_p2 }
  0x1f   : > { %1594 = shalt.err (!%p1591_p4)
}
  0x20   : > { %s1595_s26 = scalar_lea.vmem %s317_s12, 16  ;;  %s1602_s14 = scalar_lea.vmem %s317_s12, 32 }
  0x21   : > { %p1596_p7 = scmp.ne.s32.totalorder %s317_s12, %s1595_s26  ;;  %p1603_p9 = scmp.lt.s32.totalorder %s317_s12, %s317_s12 }
  0x22   : > { %p1604_p6 = scmp.lt.s32.totalorder %s1602_s14, %s1595_s26 }
  0x23   : > { %p1598_p8 = pnand %p1596_p7, %p1584_p0 }
  0x24   : > { %p1605_p5 = por %p1604_p6, %p1603_p9 }
  0x25   : > { %p1599_p11 = pneg %p1598_p8 }
  0x27   : > { %p1606_p10 = pnand %p1605_p5, %p1599_p11 }
  0x29   : > { %1609 = shalt.err (!%p1606_p10)
}
  0x2a   : > { %1482 = dma.hbm_to_vmem [thread:$0]  (!%p1806_p12), %s2051_s4, 16, %s317_s12, [#allocation3]  }
  0x2b   : > { %p2067_p13 = scmp.ne.s32.totalorder %s2065_s29, 0 }
  0x2c   : > { %p2068_p1 = scmp.eq.s32.totalorder (!%p2067_p13), %s1770_s21, 0 }
  0x2d   : > { %362 = sbr.rel (%p2067_p13) target bundleno = 2823 (0xb07), region = 64 }
  0x34   : > { %1655 = dma.done.wait (%p2068_p1), [#allocation3], 16   ;;  %p2069_p0 = pmov %p2068_p1 }
  0x35   : > { %p406_p6 = scmp.lt.s32.totalorder %s1770_s21, 1  ;;  %vm421_vm0 = vcmask 261120   ;;  %v1532_v9 = vld [vmem:[%s2052_s5] sm:$0xff]   ;;  %v1679_v10 = vmov 0.0   ;;  %vm1680_vm1 = vmmov 0   ;;  %v1533_v11 = vld [vmem:[%s2052_s5 + $0x8] sm:$0xff]  }
  0x36   : > { %1657 = vsyncadd (%p2069_p0), [#allocation3], 4294967280  ;;  %1389 = vmatprep.subr.bf16.mxu0 %v1679_v10  ;;  %1393 = vmatprep.mubr.msk.bf16.mxu0 %vm1680_vm1, %v1679_v10  ;;  %v1534_v12 = vld [vmem:[%s2053_s6] sm:$0xff]   ;;  %v1535_v31 = vld [vmem:[%s2053_s6 + $0x8] sm:$0xff]   ;;  %s1681_s13 = smov 120   ;;  %vm670_vm2 = vcmask 64512  }
  0x37   : > { %s407_s26 = scalar_select %p406_p6, %s1770_s21, 1  ;;  %1390 = vmatpush3.bf16.msra.mxu0 %v1532_v9  ;;  %1413 = vmatprep.subr.bf16.mxu1 %v1679_v10  ;;  %v1314_v23 = vld [vmem:[%s2049_s2] ss:$0 sm:$0xff]  ;;  %v1537_v37 = vld [vmem:[%s2054_s7 + $0x8] sm:$0xff]   ;;  %vm750_vm3 = vcmask 1043456   ;;  %vm723_vm4 = vcmask 195584  }
  0x38   : > { %1391 = vmatprep.subr.bf16.mxu0 %v1679_v10  ;;  %1417 = vmatprep.mubr.msk.bf16.mxu1 %vm1680_vm1, %v1679_v10  ;;  %v1315_v26 = vld [vmem:[%s2050_s3] ss:$0 sm:$0xff]  ;;  %s1682_s25 = smov 112   ;;  %s1684_s12 = smov 8   ;;  %vm943_vm5 = vcmask 130048  }
  0x39   : > { %s1311_s16 = sshll.u32 %s407_s26, 3  ;;  %s1353_s24 = sshll.u32 %s407_s26, 4  ;;  %v1536_v36 = vld [vmem:[%s2054_s7] sm:$0xff]  }
  0x3a   : > { %s409_s30 = scalar_lea.vmem %s2047_s0, %s1311_s16  ;;  %s414_s29 = scalar_lea.vmem %s2048_s1, %s1353_s24 }
  0x3b   : > { %v1840_v0 = vld [vmem:[%s409_s30] sm:$0xff]  ;;  %v418_v1 = vld [vmem:[%s414_s29 + $0x8] sm:$0xff]  ;;  %1392 = vmatpush3.bf16.msra.mxu0 %v1533_v11  ;;  %s1683_s30 = smov 104   ;;  %s1685_s26 = smov 16  }
  0x3c   : > { %v417_v2 = vld [vmem:[%s414_s29] sm:$0xff]  ;;  %v420_v3 = vmul.f32 %v1840_v0, %v1840_v0  ;;  %v439_v4 = vmul.f32 %v418_v1, %v418_v1  ;;  %1397 = vmatprep.subr.bf16.mxu0 %v1534_v12  ;;  %s1686_s16 = smov 24   ;;  %p2070_p9 = scmp.ne.s32.totalorder %s2063_s27, 0 }
  0x3d   : > { %v438_v5 = vmul.f32 %v417_v2, %v417_v2  ;;  %s1688_s24 = smov [#allocation5]  }
  0x3e   : > { %v422_v6 = vsel %vm421_vm0, %v420_v3, 0.0  ;;  %v443_v7 = vsel %vm421_vm0, %v439_v4, 0.0 }
  0x3f   : > { %v440_v8 = vsel %vm421_vm0, %v438_v5, 0.0  ;;  %423 = vadd.xlane.f32.xlu0 %v422_v6  ;;  %444 = vadd.xlane.f32.xlu1 %v443_v7 }
  0x43   : > { %441 = vadd.xlane.f32.xlu0 %v440_v8 }
  0xcc   : > { %v424_v13 = vpop.xlane.xlu0 %423  ;;  %v445_v14 = vpop.xlane.xlu1 %444 }
  0xcd   : > { %v426_v15 = vmul.f32 0.03125, %v424_v13  ;;  %v447_v16 = vmul.f32 0.03125, %v445_v14 }
  0xcf   : > { %v427_v17 = vadd.f32 1e-06, %v426_v15  ;;  %v449_v18 = vadd.f32 1e-06, %v447_v16 }
  0xd0   : > { %v442_v19 = vpop.xlane.xlu0 %441 }
  0xd1   : > { %1554 = vrsqrt.f32 %v427_v17  ;;  %v446_v20 = vmul.f32 0.03125, %v442_v19 }
  0xd2   : > { %1556 = vrsqrt.f32 %v449_v18 }
  0xd3   : > { %v448_v21 = vadd.f32 1e-06, %v446_v20 }
  0xd5   : > { %1558 = vrsqrt.f32 %v448_v21 }
  0xdb   : > { %v1555_v22 = vpop.eup %1554 }
  0xdc   : > { %v1557_v24 = vpop.eup %1556  ;;  %v429_v25 = vmul.f32 %v1555_v22, %v1840_v0 }
  0xdd   : > { %v453_v27 = vmul.f32 %v1557_v24, %v418_v1 }
  0xde   : > { %v436_v28 = vmul.f32 %v1314_v23, %v429_v25 }
  0xdf   : > { %v1559_v29 = vpop.eup %1558  ;;  %v461_v33 = vmul.f32 %v1315_v26, %v453_v27 }
  0xe0   : > { %v463_v30 = vpack.c.bf16 %v436_v28, %v436_v28  ;;  %v452_v32 = vmul.f32 %v1559_v29, %v417_v2 }
  0xe2   : > { %1394 = vmatmul.mubr.msk.bf16.vlgmr.msra.gmra.mrb[0].mxu0 %vm421_vm0, %v463_v30  ;;  %v460_v34 = vmul.f32 %v1315_v26, %v452_v32 }
  0xe3   : > { %1398 = vmatpush3.bf16.msra.mxu0 %v1534_v12 }
  0xe4   : > { %1399 = vmatprep.subr.bf16.mxu0 %v1535_v31  ;;  %v462_v35 = vpack.c.bf16 %v461_v33, %v460_v34 }
  0xe6   : > { %1401 = vmatprep.mubr.msk.bf16.mxu0 %vm421_vm0, %v462_v35 }
  0xe7   : > { %1400 = vmatpush3.bf16.msra.mxu0 %v1535_v31 }
  0xe8   : > { %1405 = vmatprep.subr.bf16.mxu0 %v1536_v36 }
  0xea   : > { %1402 = vmatmul.mubr.msk.bf16.vlgmr.msra.gmra.mrb[4].mxu0 %vm421_vm0, %v463_v30 }
  0xeb   : > { %1406 = vmatpush3.bf16.msra.mxu0 %v1536_v36  ;;  %1409 = vmatprep.mubr.msk.bf16.mxu0 %vm421_vm0, %v462_v35 }
  0xec   : > { %1407 = vmatprep.subr.bf16.mxu0 %v1537_v37 }
  0xef   : > { %1408 = vmatpush3.bf16.msra.mxu0 %v1537_v37 }
  0xf0   : > { %1421 = vmatprep.subr.bf16.mxu0 %v1679_v10 }
  0xf2   : > { %1410 = vmatmul.mubr.msk.bf16.vlgmr.msra.gmra.mrb[8].mxu0 %vm421_vm0, %v463_v30 }
  0xf3   : > { %1425 = vmatprep.mubr.msk.bf16.mxu0 %vm1680_vm1, %v1679_v10 }
 0x1b5   : > { %v517_v38 = vpop.f32.mrb[0].mxu0 }
 0x1b6   : > { %655 = vrot.lane.b32.xlu1 %v517_v38, %s1681_s13  ;;  %v1395_v39 = vpop.f32.mrb[1].mxu0 }
 0x1b7   : > { %v520_v40 = vpop.f32.mrb[2].mxu0 }
 0x1b8   : > { %v1396_v41 = vpop.f32.mrb[3].mxu0 }
 0x1bd   : > { %v1403_v42 = vpop.f32.mrb[4].mxu0 }
 0x1be   : > { %v576_v43 = vpop.f32.mrb[5].mxu0  ;;  %v667_v50 = vpack.c.bf16 %v1403_v42, %v1403_v42 }
 0x1bf   : > { %v1404_v44 = vpop.f32.mrb[6].mxu0 }
 0x1c0   : > { %v579_v45 = vpop.f32.mrb[7].mxu0  ;;  %v678_v55 = vsel %vm670_vm2, %v667_v50, 0 }
 0x1c1   : > { %v666_v46 = vpack.c.bf16 %v579_v45, %v576_v43 }
 0x1c3   : > { %797 = vrot.lane.b32.xlu1 %v666_v46, %s1681_s13  ;;  %v675_v47 = vsel %vm670_vm2, %v666_v46, 0 }
 0x1c4   : > { %1414 = vmatpush3.bf16.xpose.msra.mxu1 %v675_v47 }
 0x1c5   : > { %v1411_v48 = vpop.f32.mrb[8].mxu0  ;;  %1415 = vmatprep.subr.bf16.mxu1 %v1679_v10 }
 0x1c6   : > { %v640_v49 = vpop.f32.mrb[9].mxu0  ;;  %v1893_v54 = vpack.c.bf16 %v1411_v48, %v1411_v48 }
 0x1c7   : > { %658 = vrot.lane.b32.xlu1 %v517_v38, %s1682_s25  ;;  %v1412_v51 = vpop.f32.mrb[10].mxu0  ;;  %s403_s25 = sand.u32 1, %s1668_s18  }
 0x1c8   : > { %v643_v52 = vpop.f32.mrb[11].mxu0  ;;  %v752_v56 = vsel %vm750_vm3, %v1893_v54, 0 }
 0x1c9   : > { %v1891_v53 = vpack.c.bf16 %v643_v52, %v640_v49 }
 0x1cb   : > { %661 = vrot.lane.b32.xlu1 %v517_v38, %s1683_s30  ;;  %1422 = vmatpush3.bf16.msra.mxu0 %v1891_v53  ;;  %s1310_s30 = sshll.u32 %s403_s25, 3 }
 0x1cc   : > { %1416 = vmatpush3.bf16.xpose.msra.mxu1 %v678_v55  ;;  %1423 = vmatprep.subr.bf16.mxu0 %v1679_v10  ;;  %s405_s14 = scalar_lea.vmem [#allocation5], %s1310_s30 }
 0x1cd   : > { %1437 = vmatprep.subr.bf16.mxu1 %v1679_v10  ;;  %s1221_s29 = sshll.u32 %s405_s14, 4  ;;  %s2006_s29 = int_to_ptr.vmem [resolvable:$true] %s1221_s29 }
 0x1cf   : > { %1424 = vmatpush3.bf16.msra.mxu0 %v752_v56 }
 0x1d0   : > { %1429 = vmatprep.subr.bf16.mxu0 %v1679_v10 }
 0x228   : > { %v656_v57 = vpop.permute.xlu1 %655 }
 0x229   : > { %v664_v58 = vpack.c.bf16 %v656_v57, %v517_v38 }
 0x22b   : > { %1418 = vmatmul.mubr.msk.bf16.vlgmr.msra.gmra.mrb[0].mxu1 %vm670_vm2, %v664_v58 }
 0x22c   : > { %1441 = vmatprep.mubr.msk.bf16.mxu1 %vm1680_vm1, %v1679_v10 }
 0x235   : > { %v798_v21 = vpop.permute.xlu1 %797 }
 0x236   : > { %v805_v23 = vsel %vm670_vm2, %v798_v21, 0  ;;  %v1545_v21 = vld [vmem:[%s2056_s9 + $0x14] ss:$8 sps:$4 sm:$0xff]  }
 0x239   : > { %v659_v24 = vpop.permute.xlu1 %658 }
 0x23d   : > { %v662_v27 = vpop.permute.xlu1 %661 }
 0x23e   : > { %v665_v28 = vpack.c.bf16 %v662_v27, %v659_v24  ;;  %v1334_v27 = vld [vmem:[#allocation2] ss:$0 sm:$0xff] }
 0x2fe   : > { %v714_v59 = vpop.f32.mrb[0].mxu1 }
 0x2ff   : > { %v721_v60 = vmul.f32 0.35355338, %v714_v59  ;;  %v1419_v61 = vpop.f32.mrb[1].mxu1 }
 0x300   : > { %v717_v62 = vpop.f32.mrb[2].mxu1 }
 0x301   : > { %v722_v63 = vmul.f32 0.35355338, %v717_v62  ;;  %v1420_v1 = vpop.f32.mrb[3].mxu1  ;;  %v724_v2 = vsel %vm723_vm4, %v721_v60, -inf  ;;  %v1539_v62 = vld [vmem:[%s2055_s8 + $0x8] sm:$0xff]  }
 0x302   : > { %725 = vmax.xlane.f32.xlu0 %v724_v2 }
 0x303   : > { %v727_v3 = vsel %vm723_vm4, %v722_v63, -inf }
 0x306   : > { %728 = vmax.xlane.f32.xlu0 %v727_v3 }
 0x38f   : > { %v726_v4 = vpop.xlane.xlu0 %725 }
 0x390   : > { %v730_v5 = vsub.f32 %v721_v60, %v726_v4 }
 0x392   : > { %v732_v6 = vmul.f32 1.442695, %v730_v5 }
 0x393   : > { %v729_v7 = vpop.xlane.xlu0 %728 }
 0x394   : > { %1560 = vpow2.f32 %v732_v6  ;;  %v731_v8 = vsub.f32 %v722_v63, %v729_v7 }
 0x396   : > { %v734_v9 = vmul.f32 1.442695, %v731_v8 }
 0x398   : > { %1562 = vpow2.f32 %v734_v9 }
 0x39e   : > { %v1561_v11 = vpop.eup %1560 }
 0x39f   : > { %v736_v12 = vsel %vm723_vm4, %v1561_v11, 0.0 }
 0x3a0   : > { %737 = vadd.xlane.f32.xlu0 %v736_v12 }
 0x3a2   : > { %v1563_v13 = vpop.eup %1562 }
 0x3a3   : > { %v739_v14 = vsel %vm723_vm4, %v1563_v13, 0.0 }
 0x3a4   : > { %740 = vadd.xlane.f32.xlu0 %v739_v14 }
 0x3ba   : > { %799 = vrot.lane.b32.xlu0 %v667_v50, %s1681_s13 }
 0x42d   : > { %v738_v15 = vpop.xlane.xlu0 %737 }
 0x42e   : > { %1564 = vrcp.f32 %v738_v15 }
 0x431   : > { %v741_v16 = vpop.xlane.xlu0 %740 }
 0x432   : > { %1566 = vrcp.f32 %v741_v16 }
 0x435   : > { %v800_v25 = vpop.permute.xlu0 %799 }
 0x436   : > { %v808_v26 = vsel %vm670_vm2, %v800_v25, 0 }
 0x438   : > { %v1565_v17 = vpop.eup %1564 }
 0x439   : > { %v744_v19 = vmul.f32 %v1565_v17, %v1561_v11 }
 0x43c   : > { %v1567_v18 = vpop.eup %1566 }
 0x43d   : > { %v745_v20 = vmul.f32 %v1567_v18, %v1563_v13 }
 0x43f   : > { %v746_v22 = vpack.c.bf16 %v745_v20, %v744_v19  ;;  %v1542_v19 = vld [vmem:[%s2056_s9 + $0x4] ss:$8 sps:$4 sm:$0xff]   ;;  %v1540_v20 = vld [vmem:[%s2056_s9] ss:$8 sps:$4 sm:$0xff]  }
 0x441   : > { %1426 = vmatmul.mubr.msk.bf16.vlgmr.msra.gmra.mrb[12].mxu0 %vm723_vm4, %v746_v22  ;;  %v1687_v22 = vmov 0  }
 0x442   : > { %1430 = vmatpush3.bf16.xpose.msra.mxu0 %v805_v23  ;;  %1433 = vmatprep.mubr.msk.bf16.mxu0 %vm1680_vm1, %v1679_v10 }
 0x443   : > { %1431 = vmatprep.subr.bf16.mxu0 %v1679_v10 }
 0x44a   : > { %1432 = vmatpush3.bf16.xpose.msra.mxu0 %v808_v26 }
 0x44b   : > { %1051 = vmatprep.subr.bf16.mxu0 %v1542_v19 }
 0x451   : > { %1434 = vmatmul.mubr.msk.bf16.vlgmr.msra.gmra.mrb[16].mxu0 %vm670_vm2, %v665_v28 }
 0x452   : > { %1052 = vmatpush1.bf16.msra.mxu0 %v1540_v20  ;;  %1083 = vmatprep.mubr.bf16.mxu0 %v1687_v22 }
 0x453   : > { %1053 = vmatprep.subr.bf16.mxu0 %v1545_v21 }
 0x514   : > { %v1917_v29 = vpop.f32.mrb[12].mxu0 }
 0x515   : > { %v1427_v30 = vpop.f32.mrb[13].mxu0 }
 0x516   : > { %v791_v31 = vpop.f32.mrb[14].mxu0 }
 0x517   : > { %v1428_v32 = vpop.f32.mrb[15].mxu0 }
 0x518   : > { %v1547_v32 = vld [vmem:[%s2057_s10 + $0x8] sm:$0xff]  }
 0x524   : > { %v844_v33 = vpop.f32.mrb[16].mxu0 }
 0x525   : > { %v851_v34 = vmul.f32 0.35355338, %v844_v33  ;;  %v1435_v35 = vpop.f32.mrb[17].mxu0  ;;  %v1548_v33 = vld [vmem:[%s2057_s10 + $0x10] sm:$0xff]  }
 0x526   : > { %v847_v36 = vpop.f32.mrb[18].mxu0  ;;  %v1550_v35 = vld [vmem:[%s2057_s10 + $0x20] sm:$0xff]  }
 0x527   : > { %v852_v37 = vmul.f32 0.35355338, %v847_v36  ;;  %v1436_v38 = vpop.f32.mrb[19].mxu0  ;;  %v853_v39 = vsel %vm723_vm4, %v851_v34, -inf  ;;  %v1551_v36 = vld [vmem:[%s2057_s10 + $0x28] sm:$0xff]  }
 0x528   : > { %854 = vmax.xlane.f32.xlu1 %v853_v39  ;;  %v1553_v38 = vld [vmem:[%s2057_s10 + $0x38] sm:$0xff]  }
 0x529   : > { %v856_v40 = vsel %vm723_vm4, %v852_v37, -inf }
 0x52a   : > { %857 = vmax.xlane.f32.xlu0 %v856_v40 }
 0x540   : > { %878 = vrot.lane.b32.xlu0 %v1891_v53, %s1681_s13 }
 0x5b5   : > { %v855_v41 = vpop.xlane.xlu1 %854 }
 0x5b6   : > { %v859_v42 = vsub.f32 %v851_v34, %v855_v41  ;;  %v1549_v34 = vld [vmem:[%s2057_s10 + $0x18] sm:$0xff]  }
 0x5b7   : > { %v858_v43 = vpop.xlane.xlu0 %857 }
 0x5b8   : > { %v861_v44 = vmul.f32 1.442695, %v859_v42  ;;  %v860_v45 = vsub.f32 %v852_v37, %v858_v43  ;;  %v1552_v37 = vld [vmem:[%s2057_s10 + $0x30] sm:$0xff]  }
 0x5ba   : > { %1568 = vpow2.f32 %v861_v44  ;;  %v863_v46 = vmul.f32 1.442695, %v860_v45 }
 0x5bb   : > { %v879_v47 = vpop.permute.xlu0 %878 }
 0x5bc   : > { %1570 = vpow2.f32 %v863_v46  ;;  %1438 = vmatpush3.bf16.msra.mxu1 %v879_v47 }
 0x5bd   : > { %1439 = vmatprep.subr.bf16.mxu1 %v1679_v10 }
 0x5c4   : > { %v1569_v48 = vpop.eup %1568 }
 0x5c5   : > { %v865_v49 = vsel %vm723_vm4, %v1569_v48, 0.0 }
 0x5c6   : > { %v1571_v50 = vpop.eup %1570  ;;  %866 = vadd.xlane.f32.xlu1 %v865_v49 }
 0x5c7   : > { %v868_v51 = vsel %vm723_vm4, %v1571_v50, 0.0 }
 0x5ca   : > { %869 = vadd.xlane.f32.xlu1 %v868_v51 }
 0x5db   : > { %880 = vrot.lane.b32.xlu1 %v1893_v54, %s1681_s13  ;;  %v1538_v54 = vld [vmem:[%s2055_s8] sm:$0xff]   ;;  %s1614_s13 = sshll.u32 %s1688_s24, 4  ;;  %s1615_s13 = int_to_ptr.vmem [resolvable:$false] %s1614_s13 }
 0x5dc   : > { %s1616_s30 = scalar_lea.vmem %s1615_s13, 256  ;;  %p1617_p2 = scmp.lt.s32.totalorder %s2006_s29, %s1615_s13 }
 0x5df   : > { %931 = vrot.lane.b32.xlu1 %v791_v31, %s1684_s12  ;;  %v1546_v31 = vld [vmem:[%s2057_s10] sm:$0xff]   ;;  %s1350_s12 = sshll.u32 %s1770_s21, 7  ;;  %s1208_s21 = scalar_lea.sflag [#allocation4], %s403_s25 }
 0x653   : > { %v867_v52 = vpop.xlane.xlu1 %866 }
 0x654   : > { %1572 = vrcp.f32 %v867_v52 }
 0x657   : > { %v870_v53 = vpop.xlane.xlu1 %869 }
 0x658   : > { %1574 = vrcp.f32 %v870_v53 }
 0x65b   : > { %v881_v55 = vpop.permute.xlu1 %880 }
 0x65c   : > { %v887_v56 = vsel %vm750_vm3, %v881_v55, 0 }
 0x65d   : > { %1440 = vmatpush3.bf16.msra.mxu1 %v887_v56 }
 0x65e   : > { %1445 = vmatprep.subr.bf16.mxu1 %v1679_v10  ;;  %v1573_v57 = vpop.eup %1572 }
 0x65f   : > { %v873_v59 = vmul.f32 %v1573_v57, %v1569_v48  ;;  %v932_v4 = vpop.permute.xlu1 %931 }
 0x660   : > { %v942_v5 = vsel %vm670_vm2, %v1917_v29, %v932_v4 }
 0x662   : > { %v1575_v58 = vpop.eup %1574 }
 0x663   : > { %v874_v60 = vmul.f32 %v1575_v58, %v1571_v50 }
 0x665   : > { %v875_v61 = vpack.c.bf16 %v874_v60, %v873_v59 }
 0x667   : > { %1442 = vmatmul.mubr.msk.bf16.vlgmr.msra.gmra.mrb[4].mxu1 %vm723_vm4, %v875_v61 }
 0x668   : > { %1449 = vmatprep.mubr.msk.bf16.mxu1 %vm1680_vm1, %v1679_v10  ;;  %1446 = vmatpush3.bf16.msra.mxu1 %v1538_v54 }
 0x669   : > { %1447 = vmatprep.subr.bf16.mxu1 %v1679_v10 }
 0x66c   : > { %1448 = vmatpush3.bf16.msra.mxu1 %v1539_v62 }
 0x66d   : > { %1453 = vmatprep.subr.bf16.mxu1 %v1679_v10 }
 0x73a   : > { %v923_v63 = vpop.f32.mrb[4].mxu1 }
 0x73b   : > { %935 = vrot.lane.b32.xlu1 %v923_v63, %s1685_s26  ;;  %v1443_v1 = vpop.f32.mrb[5].mxu1  ;;  %s2004_s26 = scalar_lea.hbm %s2058_s11, %s1350_s12 }
 0x73c   : > { %v926_v2 = vpop.f32.mrb[6].mxu1 }
 0x73d   : > { %939 = vrot.lane.b32.xlu0 %v926_v2, %s1686_s16  ;;  %v1444_v3 = vpop.f32.mrb[7].mxu1  ;;  %s1610_s16 = scalar_lea.vmem %s2006_s29, 128 }
 0x73e   : > { %p1611_p5 = scmp.ne.s32.totalorder %s2006_s29, %s1610_s16  ;;  %p1618_p3 = scmp.lt.s32.totalorder %s1616_s30, %s1610_s16 }
 0x740   : > { %p1612_p10 = pnand %p1611_p5, %p2070_p9  ;;  %p1619_p4 = por %p1618_p3, %p1617_p2 }
 0x742   : > { %p1613_p12 = pneg %p1612_p10 }
 0x744   : > { %p1620_p7 = pnand %p1619_p4, %p1613_p12 }
 0x7ad   : > { %v936_v6 = vpop.permute.xlu1 %935 }
 0x7ae   : > { %v944_v7 = vsel %vm943_vm5, %v942_v5, %v936_v6 }
 0x7af   : > { %v940_v8 = vpop.permute.xlu0 %939 }
 0x7b0   : > { %v945_v9 = vsel %vm723_vm4, %v944_v7, %v940_v8 }
 0x7b1   : > { %v946_v11 = vpack.c.bf16 %v945_v9, %v945_v9 }
 0x7b3   : > { %1450 = vmatmul.mubr.msk.bf16.vlgmr.msra.gmra.mrb[8].mxu1 %vm421_vm0, %v946_v11 }
 0x7b4   : > { %1469 = vmatprep.mubr.msk.bf16.mxu1 %vm1680_vm1, %v1679_v10  ;;  %1454 = vmatpush3.bf16.msra.mxu1 %v1546_v31 }
 0x7b5   : > { %1455 = vmatprep.subr.bf16.mxu1 %v1679_v10 }
 0x7b8   : > { %1456 = vmatpush3.bf16.msra.mxu1 %v1547_v32 }
 0x7b9   : > { %1457 = vmatprep.subr.bf16.mxu1 %v1679_v10 }
 0x7bc   : > { %1458 = vmatpush3.bf16.msra.mxu1 %v1548_v33 }
 0x7bd   : > { %1459 = vmatprep.subr.bf16.mxu1 %v1679_v10 }
 0x7c0   : > { %1460 = vmatpush3.bf16.msra.mxu1 %v1549_v34 }
 0x7c1   : > { %1461 = vmatprep.subr.bf16.mxu1 %v1679_v10 }
 0x7c4   : > { %1462 = vmatpush3.bf16.msra.mxu1 %v1550_v35 }
 0x7c5   : > { %1463 = vmatprep.subr.bf16.mxu1 %v1679_v10 }
 0x7c8   : > { %1464 = vmatpush3.bf16.msra.mxu1 %v1551_v36 }
 0x7c9   : > { %1465 = vmatprep.subr.bf16.mxu1 %v1679_v10 }
 0x7cc   : > { %1466 = vmatpush3.bf16.msra.mxu1 %v1552_v37 }
 0x7cd   : > { %1467 = vmatprep.subr.bf16.mxu1 %v1679_v10 }
 0x7d0   : > { %1468 = vmatpush3.bf16.msra.mxu1 %v1553_v38 }
 0x886   : > { %v1000_v12 = vpop.f32.mrb[8].mxu1 }
 0x887   : > { %v1948_v13 = vadd.f32 %v1000_v12, %v1840_v0  ;;  %v1451_v14 = vpop.f32.mrb[9].mxu1  ;;  %v1543_v0 = vld [vmem:[%s2056_s9 + $0x10] ss:$8 sps:$4 sm:$0xff]  }
 0x888   : > { %v1003_v15 = vpop.f32.mrb[10].mxu1  ;;  %1054 = vmatpush1.bf16.msra.mxu0 %v1543_v0 }
 0x889   : > { %v1452_v16 = vpop.f32.mrb[11].mxu1  ;;  %v1008_v17 = vmul.f32 %v1948_v13, %v1948_v13 }
 0x88b   : > { %v1009_v18 = vsel %vm421_vm0, %v1008_v17, 0.0 }
 0x88c   : > { %1010 = vadd.xlane.f32.xlu1 %v1009_v18 }
 0x919   : > { %v1011_v23 = vpop.xlane.xlu1 %1010 }
 0x91a   : > { %v1012_v24 = vmul.f32 0.03125, %v1011_v23 }
 0x91c   : > { %v1013_v25 = vadd.f32 1e-06, %v1012_v24 }
 0x91e   : > { %1576 = vrsqrt.f32 %v1013_v25 }
 0x928   : > { %v1577_v26 = vpop.eup %1576 }
 0x929   : > { %v1015_v28 = vmul.f32 %v1577_v26, %v1948_v13 }
 0x92b   : > { %v1022_v29 = vmul.f32 %v1334_v27, %v1015_v28 }
 0x92d   : > { %v1023_v30 = vpack.c.bf16 %v1022_v29, %v1022_v29 }
 0x92f   : > { %1339 = vmatmul.mubr.msk.bf16.vlgmr.msra.gmra.mrb[20].mxu0 %vm421_vm0, %v1023_v30 }
 0xa02   : > { %v1085_v39 = vpop.f32.mrb[20].mxu0 }
 0xa03   : > { %v1340_v40 = vmul.f32 -1.442695, %v1085_v39  ;;  %v1087_v41 = vpop.f32.mrb[21].mxu0 }
 0xa04   : > { %v1089_v42 = vpop.f32.mrb[22].mxu0 }
 0xa05   : > { %1578 = vpow2.f32 %v1340_v40  ;;  %v1090_v43 = vpop.f32.mrb[23].mxu0 }
 0xa0f   : > { %v1579_v44 = vpop.eup %1578 }
 0xa10   : > { %v1095_v45 = vadd.f32 1.0, %v1579_v44 }
 0xa12   : > { %1580 = vrcp.f32 %v1095_v45 }
 0xa1c   : > { %v1581_v46 = vpop.eup %1580 }
 0xa1d   : > { %v1098_v47 = vmul.f32 %v1581_v46, %v1085_v39 }
 0xa1f   : > { %v1099_v48 = vmul.f32 %v1098_v47, %v1087_v41 }
 0xa21   : > { %v1100_v10 = vpack.c.bf16 %v1099_v48, %v1099_v48 }
 0xa23   : > { %1470 = vmatmul.mubr.bf16.vlgmr.msra.gmra.mrb[12].mxu1 %v1100_v10 }
 0xaf6   : > { %v1199_v49 = vpop.f32.mrb[12].mxu1 }
 0xaf7   : > { %v1205_v50 = vadd.f32 %v1199_v49, %v1948_v13  ;;  %v1471_v51 = vpop.f32.mrb[13].mxu1 }
 0xaf8   : > { %v1202_v52 = vpop.f32.mrb[14].mxu1 }
 0xaf9   : > { %v1472_v53 = vpop.f32.mrb[15].mxu1  ;;  %1206 = vst.msk [vmem:[%s405_s14] sm:$0xff] %vm421_vm0, %v1205_v50 }
 0xafa   : > { %1623 = shalt.err (!%p1620_p7)
}
 0xafb   : > { %s1624_s25 = scalar_lea.hbm %s2004_s26, 128  ;;  %s1628_s15 = scalar_lea.hbm %s2058_s11, 256 }
 0xafc   : > { %p1625_p8 = scmp.ne.s32.totalorder %s2004_s26, %s1624_s25  ;;  %p1629_p1 = scmp.lt.u32.totalorder %s2004_s26, %s2058_s11 }
 0xafd   : > { %p1630_p0 = scmp.lt.u32.totalorder %s1628_s15, %s1624_s25  ;;  %p1632_p5 = scmp.lt.u32.totalorder %s1624_s25, %s2004_s26 }
 0xafe   : > { %p1626_p11 = pnand %p1625_p8, %p2070_p9 }
 0xaff   : > { %p1631_p6 = por %p1630_p0, %p1629_p1 }
 0xb00   : > { %p1627_p13 = pneg %p1626_p11 }
 0xb01   : > { %p1633_p10 = por %p1632_p5, %p1631_p6 }
 0xb03   : > { %p1634_p12 = pnand %p1633_p10, %p1627_p13 }
 0xb05   : > { %1637 = shalt.err (!%p1634_p12)
}
 0xb06   : > { %1477 = dma.vmem_to_hbm [thread:$0]  (%p2070_p9), %s2006_s29, 128, %s2004_s26, %s1208_s21  }
 0xb07 PF: > { %p1489_p2 = scmp.ge.s32.totalorder %s1676_s20, 2  ;;  %s1233_s16 = sand.u32 1, %s1664_s17  }
 0xb08   : > { %p2071_p3 = scmp.ne.s32.totalorder %s2064_s28, 0  ;;  %s1234_s13 = scalar_lea.sflag [#allocation4], %s1233_s16 }
 0xb0a   : > { %p1484_p4 = pnand %p1489_p2, %p2071_p3 }
 0xb0c   : > { %1659 = dma.done.wait (!%p1484_p4), %s1234_s13, 128  }
 0xb0d   : > { %1661 = vsyncadd (!%p1484_p4), %s1234_s13, 4294967168  ;;  %s2072_s30 = sld [smem:[#allocation8_spill]]  ;;  %p22_p7 = scmp.ge.s32.totalorder %s1774_s23, 4  }
 0xb0e   : > { %s2073_s17 = smov %s1668_s18  ;;  %s2074_s18 = smov %s1672_s19 }
 0xb0f   : > { %s2076_s20 = smov %s1774_s23  ;;  %24 = sbr.rel (!%p22_p7) target bundleno = 4 (0x4), region = 107 }
 0xb13   : > { %s2075_s19 = smov %s2072_s30 }
 0xb16   :  { %1239 = vsyncpa [#allocation3], 1 }
 0xb17   :  { %1241 = vsyncpa [#allocation3 + $0x1], 1 }
 0xb18   :  { %1242 = vsyncpa [#allocation4], 1 }
 0xb19   :  { %1244 = vsyncpa [#allocation4 + $0x1], 1 }

</bundles_post_ra>
